<compile_context>
chip_gen: v7x
topology: tpu7x:2x2x1
jax: 0.10.0
libtpu: 0.0.40
codegen_flags: <defaults>
</compile_context>

<pallas_src>
import functools

import jax
import jax.numpy as jnp
from jax import lax
from jax.experimental import pallas as pl
from jax.experimental.pallas import tpu as pltpu

EPS = 1e-5
_LANE = 128
_SUBLANE = 8
# 48 MiB works on every generation: above the default scoped limits (v5e 16 MiB,
# v6e 32 MiB) and still leaves headroom under v7x's 64 MiB physical VMEM.
_VMEM_LIMIT = 48 * 1024 * 1024
_VMEM_TILE_BUDGET = 40 * 1024 * 1024  # what _pick_batch_tile sizes the streaming tiles against


def _round_up(n, m):
    return -(-n // m) * m


# --------------------------------------------------------------------------- #
# Kernels
# --------------------------------------------------------------------------- #
def make_phi_setsum_rho1_kernel(n_phi, tb, s):
    """Kernel 1: phi MLP + weighted per-set sum + fused first-rho Linear+ReLU.

    refs: x (tb*s, Dp) f32, w (tb*s, 1) f32,
          (W_phi, b_phi) * n_phi, W_rho1, b_rho1, out (tb, H1) f32.
    """
    def kernel(x_ref, w_ref, *refs):
        f32 = jnp.float32
        h = x_ref[...]                                            # (tb*s, Dp) f32
        for l in range(n_phi):
            w_l, b_l = refs[2 * l], refs[2 * l + 1]
            h = jnp.dot(h, w_l[...], preferred_element_type=f32) + b_l[...]
            h = jnp.maximum(h, 0.0)                               # (tb*s, P_l)
        hw = h * w_ref[...]                                       # weight * phi(x)
        p = hw.shape[-1]
        # per-set sum; s % 8 == 0 keeps the sublane split layout-preserving (XLU reduce)
        z = jnp.sum(hw.reshape(tb, s, p), axis=1)                 # (tb, P)
        # fused first rho layer (Linear + ReLU); its BatchNorm lives in kernel 2
        w_r, b_r, out_ref = refs[2 * n_phi], refs[2 * n_phi + 1], refs[2 * n_phi + 2]
        y = jnp.dot(z, w_r[...], preferred_element_type=f32) + b_r[...]
        out_ref[...] = jnp.maximum(y, 0.0)                        # (tb, H1)
    return kernel


def make_rho_tail_kernel(n_rest, batch):
    """Kernel 2: BatchNorm of rho layer 1, then (Linear+ReLU+BatchNorm) * n_rest.

    refs: y1 (B, H1) f32, gamma1, beta1, (W, b, gamma, beta) * n_rest, out (B, Hout).
    Training-mode BatchNorm1d: biased batch variance, eps=1e-5, shifted two-pass form.
    """
    inv_b = 1.0 / float(batch)

    def kernel(y_ref, *refs):
        f32 = jnp.float32

        def batchnorm(y, g, be):
            mean = jnp.sum(y, axis=0, keepdims=True) * inv_b
            d = y - mean
            var = jnp.sum(d * d, axis=0, keepdims=True) * inv_b   # biased, no cancellation
            return d * lax.rsqrt(var + EPS) * g + be

        z = batchnorm(y_ref[...], refs[0][...], refs[1][...])
        for l in range(n_rest):
            w_l, b_l, g_l, be_l = refs[2 + 4 * l: 2 + 4 * l + 4]
            y = jnp.dot(z, w_l[...], preferred_element_type=f32) + b_l[...]
            z = batchnorm(jnp.maximum(y, 0.0), g_l[...], be_l[...])
        refs[2 + 4 * n_rest][...] = z
    return kernel


# --------------------------------------------------------------------------- #
# Parameter init (PyTorch defaults)
# --------------------------------------------------------------------------- #
def init_linear(key, d_in, d_out):
    """nn.Linear default init; weight stored as (d_in, d_out) for x @ W."""
    k = 1.0 / jnp.sqrt(jnp.float32(d_in))
    kw, kb = jax.random.split(key)
    w = jax.random.uniform(kw, (d_in, d_out), jnp.float32, -k, k)
    b = jax.random.uniform(kb, (1, d_out), jnp.float32, -k, k)
    return w, b


def init_deepset_params(key, indim, phi_layers, rho_layers):
    phi_params, rho_params = [], []
    d = indim
    for h in phi_layers:
        key, sub = jax.random.split(key)
        phi_params.append(init_linear(sub, d, h))
        d = h
    d = phi_layers[-1]
    for h in rho_layers:
        key, sub = jax.random.split(key)
        w, b = init_linear(sub, d, h)
        gamma = jnp.ones((1, h), jnp.float32)     # BatchNorm1d default affine
        beta = jnp.zeros((1, h), jnp.float32)
        rho_params.append((w, b, gamma, beta))
        d = h
    return phi_params, rho_params


# --------------------------------------------------------------------------- #
# Tiling
# --------------------------------------------------------------------------- #
def _pick_batch_tile(B, S, bytes_per_row, vmem_budget=_VMEM_TILE_BUDGET, max_rows=8192):
    """Largest batch tile tb (B % tb == 0) whose tb*S rows fit the VMEM budget.

    Per-grid-step overhead is ~0.35 us, so tiles should be thousands of rows
    (target 2048-8192). tb stays sublane-aligned (tb % 8 == 0 or tb == B) and, when
    B allows, B // tb >= 2 so the "parallel" grid axis can shard across both
    TensorCores on v7x and the double-buffered pipeline has more than one step.
    """
    rows_cap = int(max(_SUBLANE, min(max_rows, vmem_budget // max(bytes_per_row, 1))))
    cands = [d for d in range(1, B + 1) if B % d == 0 and (d % _SUBLANE == 0 or d == B)]
    fitting = [d for d in cands if d * S <= rows_cap] or [min(cands)]
    tb = max(fitting)
    if tb == B:
        smaller = [d for d in fitting if d < B]
        if smaller:
            tb = max(smaller)
    return tb


# --------------------------------------------------------------------------- #
# Forward wrapper
# --------------------------------------------------------------------------- #
@functools.partial(jax.jit, static_argnames=("batch_tile",))
def deepset_forward(x, weight, phi_params, rho_params, batch_tile=None):
    B, S, D = x.shape
    n_phi, n_rho = len(phi_params), len(rho_params)
    P = phi_params[-1][0].shape[1]
    H1 = rho_params[0][0].shape[1]
    Hout = rho_params[-1][0].shape[1]

    xf = x.astype(jnp.float32)
    wgt = weight.reshape(B, S).astype(jnp.float32)

    # Pad the set dim S to a multiple of 8 with zero-weight elements so the in-kernel
    # (tb*S, P) -> (tb, S, P) reshape + sum(axis=1) stays sublane-tile aligned.
    Sp = _round_up(S, _SUBLANE)
    if Sp != S:
        xf = jnp.pad(xf, ((0, 0), (0, Sp - S), (0, 0)))
        wgt = jnp.pad(wgt, ((0, 0), (0, Sp - S)))

    # Pad the input feature dim to a multiple of 128 (zero columns + zero W rows is a
    # no-op on the matmul); the VMEM block lane-pads to 128 anyway and this gives a
    # clean full-K pass (notably on v5e's 128x128 MXUs).
    Dp = _round_up(D, _LANE)
    w_phi0, b_phi0 = phi_params[0]
    if Dp != D:
        xf = jnp.pad(xf, ((0, 0), (0, 0), (0, Dp - D)))
        w_phi0 = jnp.pad(w_phi0, ((0, Dp - D), (0, 0)))

    xrows = xf.reshape(B * Sp, Dp)
    # Set weights stay a flat (rows, 1) f32 column: lane-padded in VMEM (512 B/row,
    # charged below in bytes_per_row) but a layout Mosaic handles with no relayout.
    wflat = wgt.reshape(B * Sp, 1)

    # ---- tile size: biggest batch tile whose streaming blocks fit the VMEM budget ----
    widths = [Dp] + [w.shape[1] for w, _ in phi_params] + [H1]
    lane_w = max(_round_up(w, _LANE) for w in widths)
    # double-buffered x block + double-buffered lane-padded (rows,1) weight block
    # + ~3 live activation slabs of the widest layer
    bytes_per_row = 4 * (2 * Dp + 2 * _LANE + 3 * lane_w)
    tb = batch_tile if batch_tile is not None else _pick_batch_tile(B, Sp, bytes_per_row)
    assert B % tb == 0 and (tb % _SUBLANE == 0 or tb == B), "invalid batch tile"
    rows = tb * Sp

    # -------- kernel 1: phi + weighted set-sum + first rho Linear+ReLU -------- #
    in_specs = [pl.BlockSpec((rows, Dp), lambda i: (i, 0)),
                pl.BlockSpec((rows, 1), lambda i: (i, 0))]
    operands = [xrows, wflat]
    flops = 0
    bytes_acc = xrows.size * 4 + wflat.size * 4 + B * H1 * 4
    d_prev = Dp
    phi_ops = [(w_phi0, b_phi0)] + list(phi_params[1:])
    for w, b in phi_ops:
        # constant index maps -> weights stay resident in VMEM (DMA'd once)
        in_specs += [pl.BlockSpec(w.shape, lambda i: (0, 0)),
                     pl.BlockSpec(b.shape, lambda i: (0, 0))]
        operands += [w.astype(jnp.float32), b.astype(jnp.float32)]
        flops += 2 * B * Sp * d_prev * w.shape[1]
        bytes_acc += (w.size + b.size) * 4
        d_prev = w.shape[1]
    w_r1, b_r1 = rho_params[0][0], rho_params[0][1]
    in_specs += [pl.BlockSpec(w_r1.shape, lambda i: (0, 0)),
                 pl.BlockSpec(b_r1.shape, lambda i: (0, 0))]
    operands += [w_r1.astype(jnp.float32), b_r1.astype(jnp.float32)]
    flops += 2 * B * Sp * P + 2 * B * P * H1     # weighting + set-sum + fused rho1 matmul
    bytes_acc += (w_r1.size + b_r1.size) * 4

    # NOTE: 128-wide layers only half-fill the 256-wide MXU on v6e/v7x; widths that are
    # multiples of 256 would improve MXU utilization there (v5e's 128x128 MXU is full).
    y1 = pl.pallas_call(
        make_phi_setsum_rho1_kernel(n_phi, tb, Sp),
        out_shape=jax.ShapeDtypeStruct((B, H1), jnp.float32),
        grid=(B // tb,),
        in_specs=in_specs,
        out_specs=pl.BlockSpec((tb, H1), lambda i: (i, 0)),
        compiler_params=pltpu.CompilerParams(
            dimension_semantics=("parallel",),               # megacore sharding on v7x
            vmem_limit_bytes=_VMEM_LIMIT),
        cost_estimate=pl.CostEstimate(
            flops=int(flops), transcendentals=0, bytes_accessed=int(bytes_acc)),
    )(*operands)

    # -------- kernel 2: BatchNorm of rho layer 1 + remaining rho layers -------- #
    # Full-batch so BatchNorm1d statistics are exact over all B rows.
    # TODO(synk): for very large B, tile this kernel (grid over rows + two-pass BN);
    #             at small/medium B it is a tiny latency-bound tail.
    vmem = pl.BlockSpec(memory_space=pltpu.MemorySpace.VMEM)
    g1, be1 = rho_params[0][2], rho_params[0][3]
    rho_ops = [y1, g1.astype(jnp.float32), be1.astype(jnp.float32)]
    rho_flops = 10 * B * H1
    rho_bytes = B * H1 * 4 + B * Hout * 4 + (g1.size + be1.size) * 4
    trans = H1
    d_prev = H1
    for w, b, g, be in rho_params[1:]:
        rho_ops += [w.astype(jnp.float32), b.astype(jnp.float32),
                    g.astype(jnp.float32), be.astype(jnp.float32)]
        rho_flops += 2 * B * d_prev * w.shape[1] + 10 * B * w.shape[1]
        rho_bytes += (w.size + b.size + g.size + be.size) * 4
        trans += w.shape[1]
        d_prev = w.shape[1]

    out = pl.pallas_call(
        make_rho_tail_kernel(n_rho - 1, B),
        out_shape=jax.ShapeDtypeStruct((B, Hout), jnp.float32),
        in_specs=[vmem] * len(rho_ops),
        out_specs=vmem,
        compiler_params=pltpu.CompilerParams(vmem_limit_bytes=_VMEM_LIMIT),
        cost_estimate=pl.CostEstimate(
            flops=int(rho_flops), transcendentals=int(trans),
            bytes_accessed=int(rho_bytes)),
    )(*rho_ops)
    return out


# --------------------------------------------------------------------------- #
# Pure-f32 JAX reference mirroring the PyTorch forward (training-mode BN)
# --------------------------------------------------------------------------- #
def deepset_reference(x, weight, phi_params, rho_params):
    h = x.astype(jnp.float32)
    for w, b in phi_params:
        h = jnp.maximum(jnp.einsum("bsd,dh->bsh", h, w, precision="highest") + b[0], 0.0)
    z = jnp.sum(weight.astype(jnp.float32) * h, axis=1)          # (B, P)
    for w, b, g, be in rho_params:
        z = jnp.maximum(jnp.dot(z, w, precision="highest") + b, 0.0)
        mu = jnp.mean(z, axis=0, keepdims=True)
        var = jnp.mean((z - mu) ** 2, axis=0, keepdims=True)
        z = (z - mu) / jnp.sqrt(var + EPS) * g + be
    return z


if __name__ == "__main__":
    # Small but lane-friendly shapes (feature widths multiples of 128 where it matters).
    B, S, indim = 16, 16, 64
    phi_layers = [128, 128]
    rho_layers = [128, 128]

    key = jax.random.PRNGKey(0)
    k_x, k_w, k_p = jax.random.split(key, 3)
    x = jax.random.normal(k_x, (B, S, indim), jnp.float32)
    weight = jax.random.uniform(k_w, (B, S, 1), jnp.float32)

    phi_params, rho_params = init_deepset_params(k_p, indim, phi_layers, rho_layers)

    out = deepset_forward(x, weight, phi_params, rho_params)     # auto tile: tb=8, grid=2
    out = jax.block_until_ready(out)

    ref = deepset_reference(x, weight, phi_params, rho_params)
    assert out.shape == (B, rho_layers[-1])
    err = float(jnp.max(jnp.abs(out - ref)))
    # All-f32 kernel vs highest-precision reference; tolerance leaves margin for the
    # MXU f32 pass decomposition and BatchNorm's 1/std amplification.
    assert jnp.allclose(out, ref, rtol=1e-2, atol=1e-2), err

    print("KERNEL_OK")
</pallas_src>

<mosaic_0001>
module attributes {stable_mosaic.version = 11 : i64} {
  func.func @kernel(%arg0: memref<16x128xf32, #tpu.memory_space<vmem>>, %arg1: memref<1x128xf32, #tpu.memory_space<vmem>>, %arg2: memref<1x128xf32, #tpu.memory_space<vmem>>, %arg3: memref<128x128xf32, #tpu.memory_space<vmem>>, %arg4: memref<1x128xf32, #tpu.memory_space<vmem>>, %arg5: memref<1x128xf32, #tpu.memory_space<vmem>>, %arg6: memref<1x128xf32, #tpu.memory_space<vmem>>, %arg7: memref<16x128xf32, #tpu.memory_space<vmem>>) attributes {dimension_semantics = [], scalar_prefetch = 0 : i64, scratch_operands = 0 : i64, tpu.core_type = #tpu.core_type<tc>} {
    %c0 = arith.constant 0 : index
    %c0_0 = arith.constant 0 : index
    %0 = vector.load %arg0[%c0, %c0_0] : memref<16x128xf32, #tpu.memory_space<vmem>>, vector<16x128xf32>
    %c0_1 = arith.constant 0 : index
    %c0_2 = arith.constant 0 : index
    %1 = vector.load %arg1[%c0_1, %c0_2] : memref<1x128xf32, #tpu.memory_space<vmem>>, vector<1x128xf32>
    %c0_3 = arith.constant 0 : index
    %c0_4 = arith.constant 0 : index
    %2 = vector.load %arg2[%c0_3, %c0_4] : memref<1x128xf32, #tpu.memory_space<vmem>>, vector<1x128xf32>
    %cst = arith.constant dense<0.000000e+00> : vector<128xf32>
    %3 = vector.multi_reduction <add>, %0, %cst [0] : vector<16x128xf32> to vector<128xf32>
    %4 = vector.shape_cast %3 : vector<128xf32> to vector<1x128xf32>
    %cst_5 = arith.constant 6.250000e-02 : f32
    %5 = vector.broadcast %cst_5 : f32 to vector<1x128xf32>
    %6 = arith.mulf %4, %5 : vector<1x128xf32>
    %7 = vector.broadcast %6 : vector<1x128xf32> to vector<16x128xf32>
    %8 = arith.subf %0, %7 : vector<16x128xf32>
    %9 = arith.mulf %8, %8 : vector<16x128xf32>
    %cst_6 = arith.constant dense<0.000000e+00> : vector<128xf32>
    %10 = vector.multi_reduction <add>, %9, %cst_6 [0] : vector<16x128xf32> to vector<128xf32>
    %11 = vector.shape_cast %10 : vector<128xf32> to vector<1x128xf32>
    %cst_7 = arith.constant 6.250000e-02 : f32
    %12 = vector.broadcast %cst_7 : f32 to vector<1x128xf32>
    %13 = arith.mulf %11, %12 : vector<1x128xf32>
    %cst_8 = arith.constant 9.99999974E-6 : f32
    %14 = vector.broadcast %cst_8 : f32 to vector<1x128xf32>
    %15 = arith.addf %13, %14 : vector<1x128xf32>
    %16 = math.rsqrt %15 : vector<1x128xf32>
    %17 = vector.broadcast %16 : vector<1x128xf32> to vector<16x128xf32>
    %18 = arith.mulf %8, %17 : vector<16x128xf32>
    %19 = vector.broadcast %1 : vector<1x128xf32> to vector<16x128xf32>
    %20 = arith.mulf %18, %19 : vector<16x128xf32>
    %21 = vector.broadcast %2 : vector<1x128xf32> to vector<16x128xf32>
    %22 = arith.addf %20, %21 : vector<16x128xf32>
    %c0_9 = arith.constant 0 : index
    %c0_10 = arith.constant 0 : index
    %23 = vector.load %arg3[%c0_9, %c0_10] : memref<128x128xf32, #tpu.memory_space<vmem>>, vector<128x128xf32>
    %cst_11 = arith.constant dense<0.000000e+00> : vector<16x128xf32>
    %24 = tpu.matmul %22, %23, %cst_11 {dimension_numbers = #tpu.dot_dimension_numbers<[1], [0], [0], [1], [0, 0, 1, 1], [], []>} : vector<16x128xf32>, vector<128x128xf32>, vector<16x128xf32> -> vector<16x128xf32>
    %c0_12 = arith.constant 0 : index
    %c0_13 = arith.constant 0 : index
    %25 = vector.load %arg4[%c0_12, %c0_13] : memref<1x128xf32, #tpu.memory_space<vmem>>, vector<1x128xf32>
    %26 = vector.broadcast %25 : vector<1x128xf32> to vector<16x128xf32>
    %27 = arith.addf %24, %26 : vector<16x128xf32>
    %cst_14 = arith.constant 0.000000e+00 : f32
    %28 = vector.broadcast %cst_14 : f32 to vector<16x128xf32>
    %29 = arith.maximumf %27, %28 : vector<16x128xf32>
    %c0_15 = arith.constant 0 : index
    %c0_16 = arith.constant 0 : index
    %30 = vector.load %arg5[%c0_15, %c0_16] : memref<1x128xf32, #tpu.memory_space<vmem>>, vector<1x128xf32>
    %c0_17 = arith.constant 0 : index
    %c0_18 = arith.constant 0 : index
    %31 = vector.load %arg6[%c0_17, %c0_18] : memref<1x128xf32, #tpu.memory_space<vmem>>, vector<1x128xf32>
    %cst_19 = arith.constant dense<0.000000e+00> : vector<128xf32>
    %32 = vector.multi_reduction <add>, %29, %cst_19 [0] : vector<16x128xf32> to vector<128xf32>
    %33 = vector.shape_cast %32 : vector<128xf32> to vector<1x128xf32>
    %cst_20 = arith.constant 6.250000e-02 : f32
    %34 = vector.broadcast %cst_20 : f32 to vector<1x128xf32>
    %35 = arith.mulf %33, %34 : vector<1x128xf32>
    %36 = vector.broadcast %35 : vector<1x128xf32> to vector<16x128xf32>
    %37 = arith.subf %29, %36 : vector<16x128xf32>
    %38 = arith.mulf %37, %37 : vector<16x128xf32>
    %cst_21 = arith.constant dense<0.000000e+00> : vector<128xf32>
    %39 = vector.multi_reduction <add>, %38, %cst_21 [0] : vector<16x128xf32> to vector<128xf32>
    %40 = vector.shape_cast %39 : vector<128xf32> to vector<1x128xf32>
    %cst_22 = arith.constant 6.250000e-02 : f32
    %41 = vector.broadcast %cst_22 : f32 to vector<1x128xf32>
    %42 = arith.mulf %40, %41 : vector<1x128xf32>
    %cst_23 = arith.constant 9.99999974E-6 : f32
    %43 = vector.broadcast %cst_23 : f32 to vector<1x128xf32>
    %44 = arith.addf %42, %43 : vector<1x128xf32>
    %45 = math.rsqrt %44 : vector<1x128xf32>
    %46 = vector.broadcast %45 : vector<1x128xf32> to vector<16x128xf32>
    %47 = arith.mulf %37, %46 : vector<16x128xf32>
    %48 = vector.broadcast %30 : vector<1x128xf32> to vector<16x128xf32>
    %49 = arith.mulf %47, %48 : vector<16x128xf32>
    %50 = vector.broadcast %31 : vector<1x128xf32> to vector<16x128xf32>
    %51 = arith.addf %49, %50 : vector<16x128xf32>
    %c0_24 = arith.constant 0 : index
    %c0_25 = arith.constant 0 : index
    %52 = vector.load %arg7[%c0_24, %c0_25] : memref<16x128xf32, #tpu.memory_space<vmem>>, vector<16x128xf32>
    tpu.vector_store %arg7[%c0_24, %c0_25], %51 {strides = array<i32>} : memref<16x128xf32, #tpu.memory_space<vmem>>, vector<16x128xf32>,
    return
  }
}

module attributes {stable_mosaic.version = 11 : i64} {
  func.func @kernel(%arg0: i32, %arg1: memref<128x128xf32, #tpu.memory_space<vmem>>, %arg2: memref<128x1xf32, #tpu.memory_space<vmem>>, %arg3: memref<128x128xf32, #tpu.memory_space<vmem>>, %arg4: memref<1x128xf32, #tpu.memory_space<vmem>>, %arg5: memref<128x128xf32, #tpu.memory_space<vmem>>, %arg6: memref<1x128xf32, #tpu.memory_space<vmem>>, %arg7: memref<128x128xf32, #tpu.memory_space<vmem>>, %arg8: memref<1x128xf32, #tpu.memory_space<vmem>>, %arg9: memref<8x128xf32, #tpu.memory_space<vmem>>) attributes {dimension_semantics = [#tpu.dimension_semantics<parallel>], iteration_bounds = array<i64: 2>, scalar_prefetch = 0 : i64, scratch_operands = 0 : i64, tpu.core_type = #tpu.core_type<tc>, window_params = [{transform_indices = @transform_0, window_bounds = array<i64: 128, 128>}, {transform_indices = @transform_1, window_bounds = array<i64: 128, 1>}, {pipeline_mode = #tpu.pipeline_mode<synchronous>, transform_indices = @transform_2, window_bounds = array<i64: 128, 128>}, {pipeline_mode = #tpu.pipeline_mode<synchronous>, transform_indices = @transform_3, window_bounds = array<i64: 1, 128>}, {pipeline_mode = #tpu.pipeline_mode<synchronous>, transform_indices = @transform_4, window_bounds = array<i64: 128, 128>}, {pipeline_mode = #tpu.pipeline_mode<synchronous>, transform_indices = @transform_5, window_bounds = array<i64: 1, 128>}, {pipeline_mode = #tpu.pipeline_mode<synchronous>, transform_indices = @transform_6, window_bounds = array<i64: 128, 128>}, {pipeline_mode = #tpu.pipeline_mode<synchronous>, transform_indices = @transform_7, window_bounds = array<i64: 1, 128>}, {transform_indices = @transform_8, window_bounds = array<i64: 8, 128>}]} {
    %c0 = arith.constant 0 : index
    %c0_0 = arith.constant 0 : index
    %0 = vector.load %arg1[%c0, %c0_0] : memref<128x128xf32, #tpu.memory_space<vmem>>, vector<128x128xf32>
    %c0_1 = arith.constant 0 : index
    %c0_2 = arith.constant 0 : index
    %1 = vector.load %arg3[%c0_1, %c0_2] : memref<128x128xf32, #tpu.memory_space<vmem>>, vector<128x128xf32>
    %cst = arith.constant dense<0.000000e+00> : vector<128x128xf32>
    %2 = tpu.matmul %0, %1, %cst {dimension_numbers = #tpu.dot_dimension_numbers<[1], [0], [0], [1], [0, 0, 1, 1], [], []>} : vector<128x128xf32>, vector<128x128xf32>, vector<128x128xf32> -> vector<128x128xf32>
    %c0_3 = arith.constant 0 : index
    %c0_4 = arith.constant 0 : index
    %3 = vector.load %arg4[%c0_3, %c0_4] : memref<1x128xf32, #tpu.memory_space<vmem>>, vector<1x128xf32>
    %4 = vector.broadcast %3 : vector<1x128xf32> to vector<128x128xf32>
    %5 = arith.addf %2, %4 : vector<128x128xf32>
    %cst_5 = arith.constant 0.000000e+00 : f32
    %6 = vector.broadcast %cst_5 : f32 to vector<128x128xf32>
    %7 = arith.maximumf %5, %6 : vector<128x128xf32>
    %c0_6 = arith.constant 0 : index
    %c0_7 = arith.constant 0 : index
    %8 = vector.load %arg5[%c0_6, %c0_7] : memref<128x128xf32, #tpu.memory_space<vmem>>, vector<128x128xf32>
    %cst_8 = arith.constant dense<0.000000e+00> : vector<128x128xf32>
    %9 = tpu.matmul %7, %8, %cst_8 {dimension_numbers = #tpu.dot_dimension_numbers<[1], [0], [0], [1], [0, 0, 1, 1], [], []>} : vector<128x128xf32>, vector<128x128xf32>, vector<128x128xf32> -> vector<128x128xf32>
    %c0_9 = arith.constant 0 : index
    %c0_10 = arith.constant 0 : index
    %10 = vector.load %arg6[%c0_9, %c0_10] : memref<1x128xf32, #tpu.memory_space<vmem>>, vector<1x128xf32>
    %11 = vector.broadcast %10 : vector<1x128xf32> to vector<128x128xf32>
    %12 = arith.addf %9, %11 : vector<128x128xf32>
    %cst_11 = arith.constant 0.000000e+00 : f32
    %13 = vector.broadcast %cst_11 : f32 to vector<128x128xf32>
    %14 = arith.maximumf %12, %13 : vector<128x128xf32>
    %c0_12 = arith.constant 0 : index
    %c0_13 = arith.constant 0 : index
    %15 = vector.load %arg2[%c0_12, %c0_13] : memref<128x1xf32, #tpu.memory_space<vmem>>, vector<128x1xf32>
    %16 = vector.broadcast %15 : vector<128x1xf32> to vector<128x128xf32>
    %17 = arith.mulf %14, %16 : vector<128x128xf32>
    %18 = vector.shape_cast %17 : vector<128x128xf32> to vector<8x16x128xf32>
    %cst_14 = arith.constant dense<0.000000e+00> : vector<8x128xf32>
    %19 = vector.multi_reduction <add>, %18, %cst_14 [1] : vector<8x16x128xf32> to vector<8x128xf32>
    %c0_15 = arith.constant 0 : index
    %c0_16 = arith.constant 0 : index
    %20 = vector.load %arg7[%c0_15, %c0_16] : memref<128x128xf32, #tpu.memory_space<vmem>>, vector<128x128xf32>
    %cst_17 = arith.constant dense<0.000000e+00> : vector<8x128xf32>
    %21 = tpu.matmul %19, %20, %cst_17 {dimension_numbers = #tpu.dot_dimension_numbers<[1], [0], [0], [1], [0, 0, 1, 1], [], []>} : vector<8x128xf32>, vector<128x128xf32>, vector<8x128xf32> -> vector<8x128xf32>
    %c0_18 = arith.constant 0 : index
    %c0_19 = arith.constant 0 : index
    %22 = vector.load %arg8[%c0_18, %c0_19] : memref<1x128xf32, #tpu.memory_space<vmem>>, vector<1x128xf32>
    %23 = vector.broadcast %22 : vector<1x128xf32> to vector<8x128xf32>
    %24 = arith.addf %21, %23 : vector<8x128xf32>
    %cst_20 = arith.constant 0.000000e+00 : f32
    %25 = vector.broadcast %cst_20 : f32 to vector<8x128xf32>
    %26 = arith.maximumf %24, %25 : vector<8x128xf32>
    %c0_21 = arith.constant 0 : index
    %c0_22 = arith.constant 0 : index
    %27 = vector.load %arg9[%c0_21, %c0_22] : memref<8x128xf32, #tpu.memory_space<vmem>>, vector<8x128xf32>
    tpu.vector_store %arg9[%c0_21, %c0_22], %26 {strides = array<i32>} : memref<8x128xf32, #tpu.memory_space<vmem>>, vector<8x128xf32>,
    return
  }
  func.func @transform_0(%arg0: i32) -> (i32, i32) {
    %c0_i32 = arith.constant 0 : i32
    %c0_i32_0 = arith.constant 0 : i32
    return %arg0, %c0_i32 : i32, i32
  }
  func.func @transform_1(%arg0: i32) -> (i32, i32) {
    %c0_i32 = arith.constant 0 : i32
    %c0_i32_0 = arith.constant 0 : i32
    return %arg0, %c0_i32 : i32, i32
  }
  func.func @transform_2(%arg0: i32) -> (i32, i32) {
    %c0_i32 = arith.constant 0 : i32
    %c0_i32_0 = arith.constant 0 : i32
    %c0_i32_1 = arith.constant 0 : i32
    return %c0_i32, %c0_i32_0 : i32, i32
  }
  func.func @transform_3(%arg0: i32) -> (i32, i32) {
    %c0_i32 = arith.constant 0 : i32
    %c0_i32_0 = arith.constant 0 : i32
    %c0_i32_1 = arith.constant 0 : i32
    return %c0_i32, %c0_i32_0 : i32, i32
  }
  func.func @transform_4(%arg0: i32) -> (i32, i32) {
    %c0_i32 = arith.constant 0 : i32
    %c0_i32_0 = arith.constant 0 : i32
    %c0_i32_1 = arith.constant 0 : i32
    return %c0_i32, %c0_i32_0 : i32, i32
  }
  func.func @transform_5(%arg0: i32) -> (i32, i32) {
    %c0_i32 = arith.constant 0 : i32
    %c0_i32_0 = arith.constant 0 : i32
    %c0_i32_1 = arith.constant 0 : i32
    return %c0_i32, %c0_i32_0 : i32, i32
  }
  func.func @transform_6(%arg0: i32) -> (i32, i32) {
    %c0_i32 = arith.constant 0 : i32
    %c0_i32_0 = arith.constant 0 : i32
    %c0_i32_1 = arith.constant 0 : i32
    return %c0_i32, %c0_i32_0 : i32, i32
  }
  func.func @transform_7(%arg0: i32) -> (i32, i32) {
    %c0_i32 = arith.constant 0 : i32
    %c0_i32_0 = arith.constant 0 : i32
    %c0_i32_1 = arith.constant 0 : i32
    return %c0_i32, %c0_i32_0 : i32, i32
  }
  func.func @transform_8(%arg0: i32) -> (i32, i32) {
    %c0_i32 = arith.constant 0 : i32
    %c0_i32_0 = arith.constant 0 : i32
    return %arg0, %c0_i32 : i32, i32
  }
}

</mosaic_0001>

<bundles_post_ra>
// kernel: deepset_forward.3
= control target key start
LH: loop header
LB: loop body
LE: loop exit
PB: predicated region body
PF: predicated region fallthrough
CT: control target
= control target key end

     0   :  { %s476_s0 = inlined_call_operand.vmem [shape: f32[16,128], index: 0, kind: input, shape index: {}]   ;;  %s477_s1 = inlined_call_operand.vmem [shape: f32[1,128], index: 1, kind: input, shape index: {}]   ;;  %s478_s2 = inlined_call_operand.vmem [shape: f32[1,128], index: 2, kind: input, shape index: {}]   ;;  %s479_s3 = inlined_call_operand.vmem [shape: f32[128,128], index: 3, kind: input, shape index: {}]   ;;  %s480_s4 = inlined_call_operand.vmem [shape: f32[1,128], index: 4, kind: input, shape index: {}]   ;;  %s481_s5 = inlined_call_operand.vmem [shape: f32[1,128], index: 5, kind: input, shape index: {}]   ;;  %s482_s6 = inlined_call_operand.vmem [shape: f32[1,128], index: 6, kind: input, shape index: {}]   ;;  %s483_s7 = inlined_call_operand.hbm [shape: f32[16,128], index: 7, kind: output, shape index: {}]  }
   0x1   :  { %v71_v0 = vld [vmem:[%s479_s3] sm:$0xff]  ;;  %v72_v1 = vld [vmem:[%s479_s3 + $0x8] sm:$0xff]  ;;  %v73_v2 = vld [vmem:[%s479_s3 + $0x10] sm:$0xff] }
   0x2   :  { %v289_v3 = vpack.c.bf16 %v72_v1, %v71_v0  ;;  %v74_v4 = vld [vmem:[%s479_s3 + $0x18] sm:$0xff]  ;;  %v75_v6 = vld [vmem:[%s479_s3 + $0x20] sm:$0xff]  ;;  %v76_v7 = vld [vmem:[%s479_s3 + $0x28] sm:$0xff] }
   0x3   :  { %v293_v5 = vpack.c.bf16 %v74_v4, %v73_v2  ;;  %v297_v8 = vpack.c.bf16 %v76_v7, %v75_v6  ;;  %v27_v9 = vld [vmem:[%s476_s0] sm:$0xff]  ;;  %v28_v10 = vld [vmem:[%s476_s0 + $0x8] sm:$0xff]  ;;  %v77_v11 = vld [vmem:[%s479_s3 + $0x30] sm:$0xff] }
   0x4   :  { %290 = vmatprep.subr.bf16.mxu0 %v289_v3  ;;  %v78_v12 = vld [vmem:[%s479_s3 + $0x38] sm:$0xff]  ;;  %v31_v13 = vadd.f32 %v28_v10, %v27_v9 }
   0x5   :  { %292 = vmatpush3.bf16.msra.mxu0 %v289_v3 }
   0x6   :  { %294 = vmatprep.subr.bf16.mxu0 %v293_v5 }
   0x7   :  { %12 = vsyncpa [#allocation3], 0  ;;  %v32_v14 = vrot.slane %v31_v13, 4  ;;  %v301_v15 = vpack.c.bf16 %v78_v12, %v77_v11  ;;  %v79_v16 = vld [vmem:[%s479_s3 + $0x40] sm:$0xff]  ;;  %v80_v17 = vld [vmem:[%s479_s3 + $0x48] sm:$0xff] }
   0x8   :  { %v305_v20 = vpack.c.bf16 %v80_v17, %v79_v16  ;;  %v81_v21 = vld [vmem:[%s479_s3 + $0x50] sm:$0xff]  ;;  %v82_v22 = vld [vmem:[%s479_s3 + $0x58] sm:$0xff]  ;;  %v83_v26 = vld [vmem:[%s479_s3 + $0x60] sm:$0xff] }
   0x9   :  { %296 = vmatpush3.bf16.msra.mxu0 %v293_v5  ;;  %v33_v18 = vadd.f32 %v32_v14, %v31_v13  ;;  %v309_v25 = vpack.c.bf16 %v82_v22, %v81_v21  ;;  %v84_v27 = vld [vmem:[%s479_s3 + $0x68] sm:$0xff]  ;;  %v85_v31 = vld [vmem:[%s479_s3 + $0x70] sm:$0xff]  ;;  %v86_v32 = vld [vmem:[%s479_s3 + $0x78] sm:$0xff] }
   0xa   :  { %298 = vmatprep.subr.bf16.mxu0 %v297_v8  ;;  %v313_v30 = vpack.c.bf16 %v84_v27, %v83_v26  ;;  %v317_v37 = vpack.c.bf16 %v86_v32, %v85_v31  ;;  %v231_v48 = vld [vmem:[%s477_s1] ss:$0 sm:$0xff] }
   0xb   :  { %v34_v19 = vrot.slane %v33_v18, 2  ;;  %v232_v51 = vld [vmem:[%s478_s2] ss:$0 sm:$0xff] }
   0xc   :  { %v233_v56 = vld [vmem:[%s480_s4] ss:$0 sm:$0xff]  ;;  %s352_s4 = smov [#allocation2]  }
   0xd   :  { %300 = vmatpush3.bf16.msra.mxu0 %v297_v8  ;;  %v35_v23 = vadd.f32 %v34_v19, %v33_v18  ;;  %v234_v21 = vld [vmem:[%s481_s5] ss:$0 sm:$0xff]  ;;  %s220_s18 = sshll.u32 %s352_s4, 4  ;;  %s221_s18 = int_to_ptr.vmem [resolvable:$true] %s220_s18 }
   0xe   :  { %302 = vmatprep.subr.bf16.mxu0 %v301_v15  ;;  %s328_s21 = scalar_lea.vmem %s221_s18, 256  ;;  %p333_p1 = scmp.lt.s32.totalorder %s221_s18, %s221_s18 }
   0xf   :  { %v36_v24 = vrot.slane %v35_v23, 1  ;;  %p329_p0 = scmp.ne.s32.totalorder %s221_s18, %s328_s21  ;;  %p334_p2 = scmp.lt.s32.totalorder %s328_s21, %s328_s21 }
  0x11   :  { %304 = vmatpush3.bf16.msra.mxu0 %v301_v15  ;;  %v37_v28 = vadd.f32 %v36_v24, %v35_v23  ;;  %v235_v24 = vld [vmem:[%s482_s6] ss:$0 sm:$0xff]  ;;  %p335_p3 = por %p334_p2, %p333_p1 }
  0x12   :  { %306 = vmatprep.subr.bf16.mxu0 %v305_v20 }
  0x13   :  { %v38_v29 = vmul.f32 0.0625, %v37_v28  ;;  %p336_p4 = pnand %p335_p3, %p329_p0 }
  0x15   :  { %308 = vmatpush3.bf16.msra.mxu0 %v305_v20  ;;  %v39_v33 = vsub.f32 %v27_v9, %v38_v29  ;;  %v40_v34 = vsub.f32 %v28_v10, %v38_v29 }
  0x16   :  { %310 = vmatprep.subr.bf16.mxu0 %v309_v25 }
  0x17   :  { %v41_v35 = vmul.f32 %v39_v33, %v39_v33  ;;  %v42_v36 = vmul.f32 %v40_v34, %v40_v34 }
  0x19   :  { %312 = vmatpush3.bf16.msra.mxu0 %v309_v25  ;;  %v43_v38 = vadd.f32 %v42_v36, %v41_v35 }
  0x1a   :  { %314 = vmatprep.subr.bf16.mxu0 %v313_v30 }
  0x1b   :  { %v44_v39 = vrot.slane %v43_v38, 4 }
  0x1d   :  { %316 = vmatpush3.bf16.msra.mxu0 %v313_v30  ;;  %v45_v40 = vadd.f32 %v44_v39, %v43_v38 }
  0x1e   :  { %318 = vmatprep.subr.bf16.mxu0 %v317_v37 }
  0x1f   :  { %v46_v41 = vrot.slane %v45_v40, 2 }
  0x21   :  { %320 = vmatpush3.bf16.msra.mxu0 %v317_v37  ;;  %v47_v42 = vadd.f32 %v46_v41, %v45_v40 }
  0x23   :  { %v48_v43 = vrot.slane %v47_v42, 1 }
  0x25   :  { %v49_v44 = vadd.f32 %v48_v43, %v47_v42 }
  0x27   :  { %v50_v45 = vmul.f32 0.0625, %v49_v44 }
  0x29   :  { %v51_v46 = vadd.f32 1e-05, %v50_v45 }
  0x2b   :  { %324 = vrsqrt.f32 %v51_v46 }
  0x35   :  { %v325_v47 = vpop.eup %324 }
  0x36   :  { %v53_v49 = vmul.f32 %v325_v47, %v39_v33  ;;  %v54_v50 = vmul.f32 %v325_v47, %v40_v34 }
  0x38   :  { %v61_v52 = vmul.f32 %v231_v48, %v53_v49  ;;  %v62_v53 = vmul.f32 %v231_v48, %v54_v50 }
  0x3a   :  { %v69_v54 = vadd.f32 %v232_v51, %v61_v52  ;;  %v70_v55 = vadd.f32 %v232_v51, %v62_v53 }
  0x3c   :  { %286 = vmatprep.mubr.f32.mxu0 %v69_v54 }
  0x3d   :  { %287 = vmatmul.mubr.f32.vlgmr.msra.gmra.mrb[0].mxu0 %v70_v55 }
 0x110   :  { %v288_v57 = vpop.f32.mrb[0].mxu0 }
 0x111   :  { %v166_v58 = vadd.f32 %v288_v57, %v233_v56  ;;  %v160_v59 = vpop.f32.mrb[1].mxu0 }
 0x112   :  { %v161_v60 = vadd.f32 %v233_v56, %v160_v59 }
 0x113   :  { %v170_v61 = vmax.f32 %v166_v58, 0.0 }
 0x114   :  { %v169_v62 = vmax.f32 %v161_v60, 0.0 }
 0x116   :  { %v173_v63 = vadd.f32 %v170_v61, %v169_v62 }
 0x118   :  { %v174_v0 = vrot.slane %v173_v63, 4 }
 0x11a   :  { %v175_v1 = vadd.f32 %v174_v0, %v173_v63 }
 0x11c   :  { %v176_v2 = vrot.slane %v175_v1, 2 }
 0x11e   :  { %v177_v3 = vadd.f32 %v176_v2, %v175_v1 }
 0x120   :  { %v178_v4 = vrot.slane %v177_v3, 1 }
 0x122   :  { %v179_v5 = vadd.f32 %v178_v4, %v177_v3 }
 0x124   :  { %v180_v6 = vmul.f32 0.0625, %v179_v5 }
 0x126   :  { %v181_v7 = vsub.f32 %v169_v62, %v180_v6  ;;  %v182_v8 = vsub.f32 %v170_v61, %v180_v6 }
 0x128   :  { %v183_v9 = vmul.f32 %v181_v7, %v181_v7  ;;  %v184_v10 = vmul.f32 %v182_v8, %v182_v8 }
 0x12a   :  { %v185_v11 = vadd.f32 %v184_v10, %v183_v9 }
 0x12c   :  { %v186_v12 = vrot.slane %v185_v11, 4 }
 0x12e   :  { %v187_v13 = vadd.f32 %v186_v12, %v185_v11 }
 0x130   :  { %v188_v14 = vrot.slane %v187_v13, 2 }
 0x132   :  { %v189_v15 = vadd.f32 %v188_v14, %v187_v13 }
 0x134   :  { %v190_v16 = vrot.slane %v189_v15, 1 }
 0x136   :  { %v191_v17 = vadd.f32 %v190_v16, %v189_v15 }
 0x138   :  { %v192_v18 = vmul.f32 0.0625, %v191_v17 }
 0x13a   :  { %v193_v19 = vadd.f32 1e-05, %v192_v18 }
 0x13c   :  { %326 = vrsqrt.f32 %v193_v19 }
 0x146   :  { %v327_v20 = vpop.eup %326 }
 0x147   :  { %v195_v22 = vmul.f32 %v327_v20, %v181_v7  ;;  %v196_v23 = vmul.f32 %v327_v20, %v182_v8 }
 0x149   :  { %v203_v25 = vmul.f32 %v234_v21, %v195_v22  ;;  %v204_v26 = vmul.f32 %v234_v21, %v196_v23 }
 0x14b   :  { %v211_v27 = vadd.f32 %v235_v24, %v203_v25  ;;  %v212_v28 = vadd.f32 %v235_v24, %v204_v26 }
 0x14d   :  { %213 = vst [vmem:[#allocation2] sm:$0xff] %v211_v27  ;;  %214 = vst [vmem:[#allocation2 + $0x8] sm:$0xff] %v212_v28 }
 0x14e   :  { %339 = shalt.err (!%p336_p4)
}
 0x14f   :  { %s340_s23 = scalar_lea.hbm %s483_s7, 256 }
 0x150   :  { %p341_p5 = scmp.ne.s32.totalorder %s483_s7, %s340_s23  ;;  %p344_p6 = scmp.lt.u32.totalorder %s340_s23, %s483_s7 }
 0x152   :  { %p346_p7 = pnand %p344_p6, %p341_p5 }
 0x154   :  { %349 = shalt.err (!%p346_p7)
}
 0x155   :  { %s353_s26 = smov 128   ;;  %s354_s27 = smov 8  }
 0x156   :  { %226 = dma.vmem_to_hbm [thread:$0]  %s221_s18, 256, %s483_s7, [#allocation3], %s353_s26, %s353_s26, %s354_s27  }
 0x157   :  { %350 = dma.done.wait [#allocation3], 256  }
 0x158   :  { %351 = vsyncadd [#allocation3], 4294967040 }
 0x159   :  { %230 = vsyncpa [#allocation3], 1 }

// kernel: deepset_forward.2
= control target key start
LH: loop header
LB: loop body
LE: loop exit
PB: predicated region body
PF: predicated region fallthrough
CT: control target
= control target key end

     0   :  { %s1465_s27 = smov 0   ;;  %s1704_s0 = inlined_call_operand.vmem [shape: f32[256,128], index: 0, kind: input, shape index: {}]   ;;  %s1705_s1 = inlined_call_operand.vmem [shape: f32[256,1], index: 1, kind: input, shape index: {}]   ;;  %s1706_s2 = inlined_call_operand.vmem [shape: f32[128,128], index: 2, kind: input, shape index: {}]   ;;  %s1707_s3 = inlined_call_operand.vmem [shape: f32[1,128], index: 3, kind: input, shape index: {}]   ;;  %s1708_s4 = inlined_call_operand.vmem [shape: f32[128,128], index: 4, kind: input, shape index: {}]   ;;  %s1709_s5 = inlined_call_operand.vmem [shape: f32[1,128], index: 5, kind: input, shape index: {}]   ;;  %s1710_s6 = inlined_call_operand.vmem [shape: f32[128,128], index: 6, kind: input, shape index: {}]   ;;  %s1711_s7 = inlined_call_operand.vmem [shape: f32[1,128], index: 7, kind: input, shape index: {}]   ;;  %s1712_s8 = inlined_call_operand.vmem [shape: f32[16,128], index: 8, kind: output, shape index: {}]  }
   0x1 LB: > { %s1471_s28 = sadd.s32 4294967295, %s1414_s27   ;;  %p1067_p0 = scmp.ge.s32.totalorder %s1414_s27, 1  ;;  %s1414_s27 = sphi %s1465_s27, %s18_s27  }
   0x2   : > { %p274_p1 = scmp.lt.s32.totalorder %s1414_s27, 3 }
   0x4   : > { %p275_p2 = pnand %p1067_p0, %p274_p1 }
   0x5   : > { %v344_v0 = vld [vmem:[%s1706_s2] sm:$0xff] (!%p275_p2)  ;;  %v345_v1 = vld [vmem:[%s1706_s2 + $0x8] sm:$0xff] (!%p275_p2)  ;;  %v346_v2 = vld [vmem:[%s1706_s2 + $0x10] sm:$0xff] (!%p275_p2)  ;;  %s1068_s13 = sshll.u32 (!%p275_p2), %s1471_s28, 4  ;;  %vm1418_vm0 = vmmov (!%p275_p2), 0   ;;  %vm911_vm1 = vcmask (!%p275_p2), 1041409  }
   0x6   : > { %278 = sbr.rel (%p275_p2) target bundleno = 737 (0x2e1), region = 52  ;;  %v1306_v3 = vpack.c.bf16 (!%p275_p2), %v345_v1, %v344_v0  ;;  %v347_v4 = vld [vmem:[%s1706_s2 + $0x18] sm:$0xff] (!%p275_p2)  ;;  %p313_p3 = scmp.lt.s32.totalorder (!%p275_p2), %s1068_s13, 31  ;;  %v348_v6 = vld [vmem:[%s1706_s2 + $0x20] sm:$0xff] (!%p275_p2)  ;;  %v349_v7 = vld [vmem:[%s1706_s2 + $0x28] sm:$0xff] (!%p275_p2)  ;;  %v1416_v0 = vmov (!%p275_p2), 0  }
   0x7   : > { %v1310_v5 = vpack.c.bf16 (!%p275_p2), %v347_v4, %v346_v2  ;;  %v1314_v8 = vpack.c.bf16 (!%p275_p2), %v349_v7, %v348_v6  ;;  %v350_v9 = vld [vmem:[%s1706_s2 + $0x30] sm:$0xff] (!%p275_p2)  ;;  %v528_v10 = vld [vmem:[%s1708_s4] sm:$0xff] (!%p275_p2)  ;;  %v529_v11 = vld [vmem:[%s1708_s4 + $0x8] sm:$0xff] (!%p275_p2)  ;;  %1407 = vset.pattern.permute.xlu1 (!%p275_p2), %v1416_v0  ;;  %1406 = vset.pattern.permute.xlu0 (!%p275_p2), %v1416_v0  ;;  %vm913_vm2 = vcmask (!%p275_p2), 1042434   ;;  %vm915_vm3 = vcmask (!%p275_p2), 1043459   ;;  %p324_p4 = scmp.lt.s32.totalorder (!%p275_p2), %s1471_s28, 1 }
   0x8   : > { %1307 = vmatprep.subr.bf16.mxu0 (!%p275_p2), %v1306_v3  ;;  %v351_v12 = vld [vmem:[%s1706_s2 + $0x38] sm:$0xff] (!%p275_p2)  ;;  %v1338_v13 = vpack.c.bf16 (!%p275_p2), %v529_v11, %v528_v10  ;;  %v530_v14 = vld [vmem:[%s1708_s4 + $0x10] sm:$0xff] (!%p275_p2)  ;;  %v352_v19 = vld [vmem:[%s1706_s2 + $0x40] sm:$0xff] (!%p275_p2)  ;;  %vm917_vm4 = vcmask (!%p275_p2), 1044484   ;;  %vm919_vm5 = vcmask (!%p275_p2), 1045509   ;;  %vm921_vm6 = vcmask (!%p275_p2), 1046534  }
   0x9   : > { %1309 = vmatpush3.bf16.msra.mxu0 (!%p275_p2), %v1306_v3  ;;  %v531_v15 = vld [vmem:[%s1708_s4 + $0x18] sm:$0xff] (!%p275_p2)  ;;  %v1318_v18 = vpack.c.bf16 (!%p275_p2), %v351_v12, %v350_v9  ;;  %v353_v20 = vld [vmem:[%s1706_s2 + $0x48] sm:$0xff] (!%p275_p2)  ;;  %v532_v21 = vld [vmem:[%s1708_s4 + $0x20] sm:$0xff] (!%p275_p2)  ;;  %vm923_vm7 = vcmask (!%p275_p2), 1047559  }
   0xa   : > { %1311 = vmatprep.subr.bf16.mxu0 (!%p275_p2), %v1310_v5  ;;  %v1342_v17 = vpack.c.bf16 (!%p275_p2), %v531_v15, %v530_v14  ;;  %1339 = vmatprep.subr.bf16.mxu1 (!%p275_p2), %v1338_v13  ;;  %v533_v22 = vld [vmem:[%s1708_s4 + $0x28] sm:$0xff] (!%p275_p2)  ;;  %v534_v23 = vld [vmem:[%s1708_s4 + $0x30] sm:$0xff] (!%p275_p2)  ;;  %v1322_v24 = vpack.c.bf16 (!%p275_p2), %v353_v20, %v352_v19  ;;  %v535_v26 = vld [vmem:[%s1708_s4 + $0x38] sm:$0xff] (!%p275_p2) }
   0xb   : > { %1341 = vmatpush3.bf16.msra.mxu1 (!%p275_p2), %v1338_v13  ;;  %v1346_v25 = vpack.c.bf16 (!%p275_p2), %v533_v22, %v532_v21  ;;  %v354_v27 = vld [vmem:[%s1706_s2 + $0x50] sm:$0xff] (!%p275_p2)  ;;  %v355_v28 = vld [vmem:[%s1706_s2 + $0x58] sm:$0xff] (!%p275_p2)  ;;  %v1350_v29 = vpack.c.bf16 (!%p275_p2), %v535_v26, %v534_v23  ;;  %v536_v30 = vld [vmem:[%s1708_s4 + $0x40] sm:$0xff] (!%p275_p2) }
   0xc   : > { %1343 = vmatprep.subr.bf16.mxu1 (!%p275_p2), %v1342_v17  ;;  %v537_v31 = vld [vmem:[%s1708_s4 + $0x48] sm:$0xff] (!%p275_p2)  ;;  %v1326_v32 = vpack.c.bf16 (!%p275_p2), %v355_v28, %v354_v27  ;;  %v356_v33 = vld [vmem:[%s1706_s2 + $0x60] sm:$0xff] (!%p275_p2)  ;;  %v538_v36 = vld [vmem:[%s1708_s4 + $0x50] sm:$0xff] (!%p275_p2) }
   0xd   : > { %s1714_s13 = smov (!%p313_p3, %s1068_s13), 31  ;;  %1313 = vmatpush3.bf16.msra.mxu0 %v1310_v5  ;;  %v357_v34 = vld [vmem:[%s1706_s2 + $0x68] sm:$0xff]  ;;  %v1354_v35 = vpack.c.bf16 %v537_v31, %v536_v30  ;;  %v539_v37 = vld [vmem:[%s1708_s4 + $0x58] sm:$0xff]  ;;  %v358_v39 = vld [vmem:[%s1706_s2 + $0x70] sm:$0xff]  ;;  %s1716_s28 = smov (!%p324_p4, %s1471_s28), 1 }
   0xe   : > { %s1069_s22 = sshll.u32 %s1714_s13, 3  ;;  %1315 = vmatprep.subr.bf16.mxu0 %v1314_v8  ;;  %v1330_v38 = vpack.c.bf16 %v357_v34, %v356_v33  ;;  %v359_v40 = vld [vmem:[%s1706_s2 + $0x78] sm:$0xff]  ;;  %v1358_v41 = vpack.c.bf16 %v539_v37, %v538_v36  ;;  %v540_v42 = vld [vmem:[%s1708_s4 + $0x60] sm:$0xff]  ;;  %v541_v43 = vld [vmem:[%s1708_s4 + $0x68] sm:$0xff]  ;;  %s1072_s25 = sshll.u32 %s1716_s28, 3 }
   0xf   : > { %s1514_s11 = scalar_lea.vmem %s1704_s0, %s1069_s22  ;;  %1345 = vmatpush3.bf16.msra.mxu1 %v1342_v17  ;;  %v1334_v44 = vpack.c.bf16 %v359_v40, %v358_v39  ;;  %v1362_v45 = vpack.c.bf16 %v541_v43, %v540_v42  ;;  %v542_v61 = vld [vmem:[%s1708_s4 + $0x70] sm:$0xff]  ;;  %v543_v62 = vld [vmem:[%s1708_s4 + $0x78] sm:$0xff]  ;;  %s1603_s26 = scalar_lea.vmem %s1705_s1, %s1069_s22  ;;  %v1073_v17 = vld [vmem:[%s1707_s3] ss:$0 sm:$0xff] }
  0x10   : > { %v328_v16 = vld [vmem:[%s1514_s11] sm:$0xff]  ;;  %1347 = vmatprep.subr.bf16.mxu1 %v1346_v25  ;;  %v329_v46 = vld [vmem:[%s1514_s11 + $0x8] sm:$0xff]  ;;  %v330_v47 = vld [vmem:[%s1514_s11 + $0x10] sm:$0xff]  ;;  %v1366_v63 = vpack.c.bf16 %v543_v62, %v542_v61  ;;  %s327_s22 = scalar_lea.vmem %s1712_s8, %s1072_s25 }
  0x11   : > { %1191 = vmatprep.mubr.f32.mxu0 %v328_v16  ;;  %1317 = vmatpush3.bf16.msra.mxu0 %v1314_v8  ;;  %v331_v48 = vld [vmem:[%s1514_s11 + $0x18] sm:$0xff]  ;;  %v332_v49 = vld [vmem:[%s1514_s11 + $0x20] sm:$0xff]  ;;  %v333_v50 = vld [vmem:[%s1514_s11 + $0x28] sm:$0xff] }
  0x12   : > { %1319 = vmatprep.subr.bf16.mxu0 %v1318_v18  ;;  %v334_v51 = vld [vmem:[%s1514_s11 + $0x30] sm:$0xff]  ;;  %v335_v52 = vld [vmem:[%s1514_s11 + $0x38] sm:$0xff]  ;;  %v336_v53 = vld [vmem:[%s1514_s11 + $0x40] sm:$0xff] }
  0x13   : > { %1349 = vmatpush3.bf16.msra.mxu1 %v1346_v25  ;;  %v337_v54 = vld [vmem:[%s1514_s11 + $0x48] sm:$0xff]  ;;  %v338_v55 = vld [vmem:[%s1514_s11 + $0x50] sm:$0xff]  ;;  %v339_v56 = vld [vmem:[%s1514_s11 + $0x58] sm:$0xff] }
  0x14   : > { %1351 = vmatprep.subr.bf16.mxu1 %v1350_v29  ;;  %v340_v57 = vld [vmem:[%s1514_s11 + $0x60] sm:$0xff]  ;;  %v341_v58 = vld [vmem:[%s1514_s11 + $0x68] sm:$0xff]  ;;  %v342_v59 = vld [vmem:[%s1514_s11 + $0x70] sm:$0xff] }
  0x15   : > { %1321 = vmatpush3.bf16.msra.mxu0 %v1318_v18  ;;  %v343_v60 = vld [vmem:[%s1514_s11 + $0x78] sm:$0xff]  ;;  %v714_v1 = vld [vmem:[%s1603_s26 + $0x10] sm:$0xff]  ;;  %v712_v2 = vld [vmem:[%s1603_s26] sm:$0xff] }
  0x16   : > { %1323 = vmatprep.subr.bf16.mxu0 %v1322_v24  ;;  %740 = vperm.xlu1 %1407, %v714_v1   ;;  %v715_v3 = vld [vmem:[%s1603_s26 + $0x18] sm:$0xff]  ;;  %v713_v4 = vld [vmem:[%s1603_s26 + $0x8] sm:$0xff]  ;;  %v716_v6 = vld [vmem:[%s1603_s26 + $0x20] sm:$0xff] }
  0x17   : > { %1353 = vmatpush3.bf16.msra.mxu1 %v1350_v29  ;;  %730 = vperm.xlu0 %1406, %v712_v2   ;;  %v717_v5 = vld [vmem:[%s1603_s26 + $0x28] sm:$0xff]  ;;  %v719_v7 = vld [vmem:[%s1603_s26 + $0x38] sm:$0xff]  ;;  %v718_v8 = vld [vmem:[%s1603_s26 + $0x30] sm:$0xff] }
  0x18   : > { %1355 = vmatprep.subr.bf16.mxu1 %v1354_v35  ;;  %v721_v9 = vld [vmem:[%s1603_s26 + $0x48] sm:$0xff]  ;;  %v720_v10 = vld [vmem:[%s1603_s26 + $0x40] sm:$0xff]  ;;  %v723_v11 = vld [vmem:[%s1603_s26 + $0x58] sm:$0xff] }
  0x19   : > { %1325 = vmatpush3.bf16.msra.mxu0 %v1322_v24  ;;  %v722_v12 = vld [vmem:[%s1603_s26 + $0x50] sm:$0xff]  ;;  %v725_v13 = vld [vmem:[%s1603_s26 + $0x68] sm:$0xff]  ;;  %v724_v14 = vld [vmem:[%s1603_s26 + $0x60] sm:$0xff] }
  0x1a   : > { %1327 = vmatprep.subr.bf16.mxu0 %v1326_v32  ;;  %745 = vperm.xlu1 %1407, %v715_v3   ;;  %v727_v15 = vld [vmem:[%s1603_s26 + $0x78] sm:$0xff]  ;;  %v726_v16 = vld [vmem:[%s1603_s26 + $0x70] sm:$0xff]  ;;  %v880_v2 = vld [vmem:[%s1710_s6] sm:$0xff] }
  0x1b   : > { %1357 = vmatpush3.bf16.msra.mxu1 %v1354_v35  ;;  %735 = vperm.xlu0 %1406, %v713_v4   ;;  %v881_v3 = vld [vmem:[%s1710_s6 + $0x8] sm:$0xff] }
  0x1c   : > { %1359 = vmatprep.subr.bf16.mxu1 %v1358_v41  ;;  %v1371_v4 = vpack.c.bf16 %v881_v3, %v880_v2 }
  0x1d   : > { %1329 = vmatpush3.bf16.msra.mxu0 %v1326_v32 }
  0x1e   : > { %1331 = vmatprep.subr.bf16.mxu0 %v1330_v38  ;;  %755 = vperm.xlu1 %1407, %v717_v5   ;;  %v1417_v5 = vmov 0.0|0.0  }
  0x1f   : > { %1361 = vmatpush3.bf16.msra.mxu1 %v1358_v41  ;;  %750 = vperm.xlu0 %1406, %v716_v6   ;;  %v882_v6 = vld [vmem:[%s1710_s6 + $0x10] sm:$0xff] }
  0x20   : > { %1363 = vmatprep.subr.bf16.mxu1 %v1362_v45 }
  0x21   : > { %1333 = vmatpush3.bf16.msra.mxu0 %v1330_v38 }
  0x22   : > { %1335 = vmatprep.subr.bf16.mxu0 %v1334_v44  ;;  %765 = vperm.xlu1 %1407, %v719_v7   ;;  %v883_v7 = vld [vmem:[%s1710_s6 + $0x18] sm:$0xff] }
  0x23   : > { %1365 = vmatpush3.bf16.msra.mxu1 %v1362_v45  ;;  %760 = vperm.xlu0 %1406, %v718_v8   ;;  %v1374_v8 = vpack.c.bf16 %v883_v7, %v882_v6 }
  0x24   : > { %1367 = vmatprep.subr.bf16.mxu1 %v1366_v63 }
  0x25   : > { %1337 = vmatpush3.bf16.msra.mxu0 %v1334_v44 }
  0x26   : > { %775 = vperm.xlu1 %1407, %v721_v9   ;;  %1370 = vmatprep.subr.bf16.mxu0 %v1417_v5  ;;  %v884_v9 = vld [vmem:[%s1710_s6 + $0x20] sm:$0xff] }
  0x27   : > { %1369 = vmatpush3.bf16.msra.mxu1 %v1366_v63  ;;  %770 = vperm.xlu0 %1406, %v720_v10   ;;  %v885_v10 = vld [vmem:[%s1710_s6 + $0x28] sm:$0xff] }
  0x28   : > { %1192 = vmatmul.mubr.f32.vlgmr.msra.gmra.mrb[0].mxu0 %v329_v46 }
  0x29   : > { %1194 = vmatprep.mubr.f32.mxu0 %v330_v47  ;;  %1372 = vmatpush3.bf16.msra.mxu0 %v1371_v4 }
  0x2a   : > { %785 = vperm.xlu1 %1407, %v723_v11   ;;  %1373 = vmatprep.subr.bf16.mxu0 %v1417_v5  ;;  %v1377_v11 = vpack.c.bf16 %v885_v10, %v884_v9 }
  0x2b   : > { %780 = vperm.xlu0 %1406, %v722_v12   ;;  %v886_v12 = vld [vmem:[%s1710_s6 + $0x30] sm:$0xff] }
  0x2c   : > { %1195 = vmatmul.mubr.f32.gmra.mrb[2].mxu0 %v331_v48 }
  0x2d   : > { %1197 = vmatprep.mubr.f32.mxu0 %v332_v49  ;;  %1375 = vmatpush3.bf16.msra.mxu0 %v1374_v8 }
  0x2e   : > { %795 = vperm.xlu1 %1407, %v725_v13   ;;  %1376 = vmatprep.subr.bf16.mxu0 %v1417_v5  ;;  %v887_v13 = vld [vmem:[%s1710_s6 + $0x38] sm:$0xff] }
  0x2f   : > { %790 = vperm.xlu0 %1406, %v724_v14   ;;  %v1380_v14 = vpack.c.bf16 %v887_v13, %v886_v12 }
  0x30   : > { %1198 = vmatmul.mubr.f32.gmra.mrb[4].mxu0 %v333_v50 }
  0x31   : > { %1200 = vmatprep.mubr.f32.mxu0 %v334_v51  ;;  %1378 = vmatpush3.bf16.msra.mxu0 %v1377_v11 }
  0x32   : > { %805 = vperm.xlu1 %1407, %v727_v15   ;;  %1379 = vmatprep.subr.bf16.mxu0 %v1417_v5  ;;  %v888_v15 = vld [vmem:[%s1710_s6 + $0x40] sm:$0xff] }
  0x33   : > { %800 = vperm.xlu0 %1406, %v726_v16   ;;  %v889_v16 = vld [vmem:[%s1710_s6 + $0x48] sm:$0xff] }
  0x34   : > { %1201 = vmatmul.mubr.f32.gmra.mrb[6].mxu0 %v335_v52 }
  0x35   : > { %1203 = vmatprep.mubr.f32.mxu0 %v336_v53  ;;  %1381 = vmatpush3.bf16.msra.mxu0 %v1380_v14 }
  0x36   : > { %1382 = vmatprep.subr.bf16.mxu0 %v1417_v5 }
  0x38   : > { %1204 = vmatmul.mubr.f32.gmra.mrb[8].mxu0 %v337_v54 }
  0x39   : > { %1206 = vmatprep.mubr.f32.mxu0 %v338_v55 }
  0x3c   : > { %1207 = vmatmul.mubr.f32.gmra.mrb[10].mxu0 %v339_v56 }
  0x3d   : > { %1209 = vmatprep.mubr.f32.mxu0 %v340_v57 }
  0x40   : > { %1210 = vmatmul.mubr.f32.gmra.mrb[12].mxu0 %v341_v58 }
  0x41   : > { %1212 = vmatprep.mubr.f32.mxu0 %v342_v59 }
  0x44   : > { %1213 = vmatmul.mubr.f32.gmra.mrb[14].mxu0 %v343_v60 }
  0xfb   : > { %v1193_v18 = vpop.f32.mrb[0].mxu0 }
  0xfc   : > { %v439_v19 = vadd.f32 %v1193_v18, %v1073_v17  ;;  %v433_v20 = vpop.f32.mrb[1].mxu0  ;;  %v890_v18 = vld [vmem:[%s1710_s6 + $0x50] sm:$0xff] }
  0xfd   : > { %v434_v21 = vadd.f32 %v1073_v17, %v433_v20 }
  0xfe   : > { %v513_v24 = vmax.f32 %v439_v19, 0.0  ;;  %v891_v19 = vld [vmem:[%s1710_s6 + $0x58] sm:$0xff] }
  0xff   : > { %v1196_v22 = vpop.f32.mrb[2].mxu0  ;;  %v512_v23 = vmax.f32 %v434_v21, 0.0  ;;  %v1386_v20 = vpack.c.bf16 %v891_v19, %v890_v18  ;;  %v892_v21 = vld [vmem:[%s1710_s6 + $0x60] sm:$0xff] }
 0x100   : > { %v449_v25 = vadd.f32 %v1196_v22, %v1073_v17  ;;  %v443_v26 = vpop.f32.mrb[3].mxu0  ;;  %v893_v22 = vld [vmem:[%s1710_s6 + $0x68] sm:$0xff] }
 0x101   : > { %v444_v27 = vadd.f32 %v1073_v17, %v443_v26  ;;  %1247 = vmatprep.mubr.f32.mxu1 %v512_v23  ;;  %v1389_v23 = vpack.c.bf16 %v893_v22, %v892_v21 }
 0x102   : > { %1248 = vmatmul.mubr.f32.vlgmr.msra.gmra.mrb[0].mxu1 %v513_v24  ;;  %v515_v30 = vmax.f32 %v449_v25, 0.0  ;;  %v894_v24 = vld [vmem:[%s1710_s6 + $0x70] sm:$0xff]  ;;  %v895_v25 = vld [vmem:[%s1710_s6 + $0x78] sm:$0xff] }
 0x103   : > { %v514_v28 = vmax.f32 %v444_v27, 0.0  ;;  %v1199_v29 = vpop.f32.mrb[4].mxu0  ;;  %v1392_v26 = vpack.c.bf16 %v895_v25, %v894_v24  ;;  %v1419_v27 = vmov 0.0  }
 0x104   : > { %v459_v31 = vadd.f32 %v1199_v29, %v1073_v17  ;;  %v453_v32 = vpop.f32.mrb[5].mxu0  ;;  %1303 = vmatprep.mubr.msk.f32.mxu0 %vm1418_vm0, %v1419_v27  ;;  %v731_v29 = vpop.permute.xlu0 %730 }
 0x105   : > { %v454_v33 = vadd.f32 %v1073_v17, %v453_v32  ;;  %1250 = vmatprep.mubr.f32.mxu1 %v514_v28  ;;  %v741_v28 = vpop.permute.xlu1 %740  ;;  %v1675_v32 = vld [vmem:[%s1709_s5] ss:$0 sm:$0xff] }
 0x106   : > { %1251 = vmatmul.mubr.f32.gmra.mrb[2].mxu1 %v515_v30  ;;  %v517_v36 = vmax.f32 %v459_v31, 0.0 }
 0x107   : > { %v516_v34 = vmax.f32 %v454_v33, 0.0  ;;  %v1202_v35 = vpop.f32.mrb[6].mxu0 }
 0x108   : > { %v469_v37 = vadd.f32 %v1202_v35, %v1073_v17  ;;  %v463_v38 = vpop.f32.mrb[7].mxu0  ;;  %v736_v31 = vpop.permute.xlu0 %735 }
 0x109   : > { %v464_v39 = vadd.f32 %v1073_v17, %v463_v38  ;;  %1253 = vmatprep.mubr.f32.mxu1 %v516_v34  ;;  %v746_v30 = vpop.permute.xlu1 %745 }
 0x10a   : > { %1254 = vmatmul.mubr.f32.gmra.mrb[4].mxu1 %v517_v36  ;;  %v519_v42 = vmax.f32 %v469_v37, 0.0 }
 0x10b   : > { %v518_v40 = vmax.f32 %v464_v39, 0.0  ;;  %v1205_v41 = vpop.f32.mrb[8].mxu0 }
 0x10c   : > { %v479_v43 = vadd.f32 %v1205_v41, %v1073_v17  ;;  %v473_v44 = vpop.f32.mrb[9].mxu0  ;;  %v751_v38 = vpop.permute.xlu0 %750 }
 0x10d   : > { %v474_v45 = vadd.f32 %v1073_v17, %v473_v44  ;;  %1256 = vmatprep.mubr.f32.mxu1 %v518_v40  ;;  %v756_v36 = vpop.permute.xlu1 %755 }
 0x10e   : > { %1257 = vmatmul.mubr.f32.gmra.mrb[6].mxu1 %v519_v42  ;;  %v521_v48 = vmax.f32 %v479_v43, 0.0 }
 0x10f   : > { %v520_v46 = vmax.f32 %v474_v45, 0.0  ;;  %v1208_v47 = vpop.f32.mrb[10].mxu0 }
 0x110   : > { %v489_v49 = vadd.f32 %v1208_v47, %v1073_v17  ;;  %v483_v50 = vpop.f32.mrb[11].mxu0 }
 0x111   : > { %v484_v51 = vadd.f32 %v1073_v17, %v483_v50  ;;  %1259 = vmatprep.mubr.f32.mxu1 %v520_v46 }
 0x112   : > { %1260 = vmatmul.mubr.f32.gmra.mrb[8].mxu1 %v521_v48  ;;  %v523_v54 = vmax.f32 %v489_v49, 0.0  ;;  %v766_v48 = vpop.permute.xlu1 %765 }
 0x113   : > { %v522_v52 = vmax.f32 %v484_v51, 0.0  ;;  %v1211_v53 = vpop.f32.mrb[12].mxu0 }
 0x114   : > { %v499_v55 = vadd.f32 %v1211_v53, %v1073_v17  ;;  %v493_v56 = vpop.f32.mrb[13].mxu0 }
 0x115   : > { %v494_v57 = vadd.f32 %v1073_v17, %v493_v56  ;;  %1262 = vmatprep.mubr.f32.mxu1 %v522_v52  ;;  %v761_v52 = vpop.permute.xlu0 %760 }
 0x116   : > { %1263 = vmatmul.mubr.f32.gmra.mrb[10].mxu1 %v523_v54  ;;  %v525_v60 = vmax.f32 %v499_v55, 0.0  ;;  %v776_v3 = vpop.permute.xlu1 %775 }
 0x117   : > { %v524_v58 = vmax.f32 %v494_v57, 0.0  ;;  %v1214_v59 = vpop.f32.mrb[14].mxu0 }
 0x118   : > { %v509_v61 = vadd.f32 %v1214_v59, %v1073_v17  ;;  %v503_v62 = vpop.f32.mrb[15].mxu0 }
 0x119   : > { %v504_v63 = vadd.f32 %v1073_v17, %v503_v62  ;;  %1265 = vmatprep.mubr.f32.mxu1 %v524_v58  ;;  %v1383_v17 = vpack.c.bf16 %v889_v16, %v888_v15  ;;  %v771_v8 = vpop.permute.xlu0 %770 }
 0x11a   : > { %1266 = vmatmul.mubr.f32.gmra.mrb[12].mxu1 %v525_v60  ;;  %v527_v1 = vmax.f32 %v509_v61, 0.0  ;;  %v786_v24 = vpop.permute.xlu1 %785 }
 0x11b   : > { %v526_v0 = vmax.f32 %v504_v63, 0.0  ;;  %1384 = vmatpush3.bf16.msra.mxu0 %v1383_v17 }
 0x11c   : > { %1385 = vmatprep.subr.bf16.mxu0 %v1417_v5 }
 0x11d   : > { %1268 = vmatprep.mubr.f32.mxu1 %v526_v0 }
 0x11e   : > { %1269 = vmatmul.mubr.f32.gmra.mrb[14].mxu1 %v527_v1 }
 0x11f   : > { %1387 = vmatpush3.bf16.msra.mxu0 %v1386_v20 }
 0x120   : > { %1388 = vmatprep.subr.bf16.mxu0 %v1417_v5 }
 0x123   : > { %1390 = vmatpush3.bf16.msra.mxu0 %v1389_v23 }
 0x124   : > { %1391 = vmatprep.subr.bf16.mxu0 %v1417_v5 }
 0x127   : > { %1393 = vmatpush3.bf16.msra.mxu0 %v1392_v26 }
 0x1d5   : > { %v1249_v33 = vpop.f32.mrb[0].mxu1 }
 0x1d6   : > { %v623_v34 = vadd.f32 %v1249_v33, %v1675_v32  ;;  %v617_v35 = vpop.f32.mrb[1].mxu1 }
 0x1d7   : > { %v618_v37 = vadd.f32 %v1675_v32, %v617_v35 }
 0x1d8   : > { %v697_v39 = vmax.f32 %v623_v34, 0.0 }
 0x1d9   : > { %v696_v40 = vmax.f32 %v618_v37, 0.0  ;;  %v1252_v41 = vpop.f32.mrb[2].mxu1 }
 0x1da   : > { %v809_v42 = vmul.f32 %v736_v31, %v697_v39  ;;  %v633_v43 = vadd.f32 %v1252_v41, %v1675_v32  ;;  %v627_v44 = vpop.f32.mrb[3].mxu1 }
 0x1db   : > { %v808_v45 = vmul.f32 %v731_v29, %v696_v40  ;;  %v628_v46 = vadd.f32 %v1675_v32, %v627_v44  ;;  %v781_v29 = vpop.permute.xlu0 %780 }
 0x1dc   : > { %v699_v47 = vmax.f32 %v633_v43, 0.0 }
 0x1dd   : > { %v824_v49 = vadd.f32 %v809_v42, %v808_v45  ;;  %v698_v50 = vmax.f32 %v628_v46, 0.0  ;;  %v1255_v51 = vpop.f32.mrb[4].mxu1 }
 0x1de   : > { %v811_v53 = vmul.f32 %v746_v30, %v699_v47  ;;  %v643_v54 = vadd.f32 %v1255_v51, %v1675_v32  ;;  %v637_v55 = vpop.f32.mrb[5].mxu1  ;;  %v796_v51 = vpop.permute.xlu1 %795 }
 0x1df   : > { %v825_v56 = vrot.slane %v824_v49, 4  ;;  %v810_v57 = vmul.f32 %v741_v28, %v698_v50  ;;  %v638_v58 = vadd.f32 %v1675_v32, %v637_v55 }
 0x1e0   : > { %v701_v59 = vmax.f32 %v643_v54, 0.0 }
 0x1e1   : > { %v826_v60 = vadd.f32 %v825_v56, %v824_v49  ;;  %v831_v61 = vadd.f32 %v811_v53, %v810_v57  ;;  %v700_v62 = vmax.f32 %v638_v58, 0.0  ;;  %v1258_v63 = vpop.f32.mrb[6].mxu1  ;;  %v791_v56 = vpop.permute.xlu0 %790 }
 0x1e2   : > { %v813_v0 = vmul.f32 %v756_v36, %v701_v59  ;;  %v653_v1 = vadd.f32 %v1258_v63, %v1675_v32  ;;  %v647_v2 = vpop.f32.mrb[7].mxu1 }
 0x1e3   : > { %v827_v4 = vrot.slane %v826_v60, 2  ;;  %v832_v5 = vrot.slane %v831_v61, 4  ;;  %v812_v6 = vmul.f32 %v751_v38, %v700_v62  ;;  %v648_v7 = vadd.f32 %v1675_v32, %v647_v2 }
 0x1e4   : > { %v703_v9 = vmax.f32 %v653_v1, 0.0 }
 0x1e5   : > { %v828_v10 = vadd.f32 %v827_v4, %v826_v60  ;;  %v833_v11 = vadd.f32 %v832_v5, %v831_v61  ;;  %v838_v12 = vadd.f32 %v813_v0, %v812_v6  ;;  %v702_v13 = vmax.f32 %v648_v7, 0.0  ;;  %v1261_v14 = vpop.f32.mrb[8].mxu1 }
 0x1e6   : > { %v815_v15 = vmul.f32 %v766_v48, %v703_v9  ;;  %v663_v16 = vadd.f32 %v1261_v14, %v1675_v32  ;;  %v657_v17 = vpop.f32.mrb[9].mxu1 }
 0x1e7   : > { %v834_v18 = vrot.slane %v833_v11, 2  ;;  %v839_v19 = vrot.slane %v838_v12, 4  ;;  %v814_v20 = vmul.f32 %v761_v52, %v702_v13  ;;  %v829_v21 = vrot.slane %v828_v10, 1 }
 0x1e8   : > { %v705_v22 = vmax.f32 %v663_v16, 0.0  ;;  %v658_v23 = vadd.f32 %v1675_v32, %v657_v17  ;;  %v801_v16 = vpop.permute.xlu0 %800 }
 0x1e9   : > { %v835_v25 = vadd.f32 %v834_v18, %v833_v11  ;;  %v840_v26 = vadd.f32 %v839_v19, %v838_v12  ;;  %v845_v27 = vadd.f32 %v815_v15, %v814_v20  ;;  %v1264_v28 = vpop.f32.mrb[10].mxu1  ;;  %v830_v39 = vadd.f32 %v829_v21, %v828_v10  ;;  %v806_v12 = vpop.permute.xlu1 %805 }
 0x1ea   : > { %v817_v30 = vmul.f32 %v776_v3, %v705_v22  ;;  %v704_v31 = vmax.f32 %v658_v23, 0.0  ;;  %v673_v33 = vadd.f32 %v1264_v28, %v1675_v32  ;;  %v667_v34 = vpop.f32.mrb[11].mxu1 }
 0x1eb   : > { %v836_v35 = vrot.slane %v835_v25, 1  ;;  %v841_v36 = vrot.slane %v840_v26, 2  ;;  %v846_v37 = vrot.slane %v845_v27, 4  ;;  %v668_v38 = vadd.f32 %v1675_v32, %v667_v34 }
 0x1ec   : > { %v816_v40 = vmul.f32 %v771_v8, %v704_v31  ;;  %v707_v41 = vmax.f32 %v673_v33, 0.0 }
 0x1ed   : > { %v837_v42 = vadd.f32 %v836_v35, %v835_v25  ;;  %v842_v43 = vadd.f32 %v841_v36, %v840_v26  ;;  %v847_v44 = vadd.f32 %v846_v37, %v845_v27  ;;  %v706_v45 = vmax.f32 %v668_v38, 0.0  ;;  %v1267_v46 = vpop.f32.mrb[12].mxu1 }
 0x1ee   : > { %v852_v47 = vadd.f32 %v817_v30, %v816_v40  ;;  %v819_v48 = vmul.f32 %v786_v24, %v707_v41  ;;  %v683_v49 = vadd.f32 %v1267_v46, %v1675_v32  ;;  %v677_v50 = vpop.f32.mrb[13].mxu1 }
 0x1ef   : > { %v912_v52 = vsel %vm911_vm1, %v837_v42, %v830_v39  ;;  %v843_v53 = vrot.slane %v842_v43, 1  ;;  %v848_v54 = vrot.slane %v847_v44, 2  ;;  %v818_v55 = vmul.f32 %v781_v29, %v706_v45  ;;  %v1075_v45 = vld [vmem:[%s1711_s7] ss:$0 sm:$0xff] }
 0x1f0   : > { %v853_v57 = vrot.slane %v852_v47, 4  ;;  %v709_v58 = vmax.f32 %v683_v49, 0.0  ;;  %v678_v59 = vadd.f32 %v1675_v32, %v677_v50 }
 0x1f1   : > { %v844_v60 = vadd.f32 %v843_v53, %v842_v43  ;;  %v849_v61 = vadd.f32 %v848_v54, %v847_v44  ;;  %v859_v62 = vadd.f32 %v819_v48, %v818_v55  ;;  %v1270_v63 = vpop.f32.mrb[14].mxu1 }
 0x1f2   : > { %v854_v0 = vadd.f32 %v853_v57, %v852_v47  ;;  %v821_v1 = vmul.f32 %v796_v51, %v709_v58  ;;  %v708_v2 = vmax.f32 %v678_v59, 0.0  ;;  %v693_v3 = vadd.f32 %v1270_v63, %v1675_v32  ;;  %v687_v4 = vpop.f32.mrb[15].mxu1 }
 0x1f3   : > { %v914_v5 = vsel %vm913_vm2, %v844_v60, %v912_v52  ;;  %v850_v6 = vrot.slane %v849_v61, 1  ;;  %v860_v7 = vrot.slane %v859_v62, 4  ;;  %v688_v8 = vadd.f32 %v1675_v32, %v687_v4 }
 0x1f4   : > { %v855_v9 = vrot.slane %v854_v0, 2  ;;  %v820_v10 = vmul.f32 %v791_v56, %v708_v2  ;;  %v711_v11 = vmax.f32 %v693_v3, 0.0 }
 0x1f5   : > { %v851_v13 = vadd.f32 %v850_v6, %v849_v61  ;;  %v861_v14 = vadd.f32 %v860_v7, %v859_v62  ;;  %v710_v15 = vmax.f32 %v688_v8, 0.0 }
 0x1f6   : > { %v856_v17 = vadd.f32 %v855_v9, %v854_v0  ;;  %v866_v18 = vadd.f32 %v821_v1, %v820_v10  ;;  %v823_v19 = vmul.f32 %v806_v12, %v711_v11 }
 0x1f7   : > { %v862_v20 = vrot.slane %v861_v14, 2  ;;  %v822_v21 = vmul.f32 %v801_v16, %v710_v15  ;;  %v916_v22 = vsel %vm915_vm3, %v851_v13, %v914_v5 }
 0x1f8   : > { %v857_v23 = vrot.slane %v856_v17, 1  ;;  %v867_v24 = vrot.slane %v866_v18, 4 }
 0x1f9   : > { %v863_v25 = vadd.f32 %v862_v20, %v861_v14  ;;  %v873_v26 = vadd.f32 %v823_v19, %v822_v21 }
 0x1fa   : > { %v858_v32 = vadd.f32 %v857_v23, %v856_v17  ;;  %v868_v27 = vadd.f32 %v867_v24, %v866_v18 }
 0x1fb   : > { %v864_v28 = vrot.slane %v863_v25, 1  ;;  %v874_v29 = vrot.slane %v873_v26, 4 }
 0x1fc   : > { %v869_v30 = vrot.slane %v868_v27, 2  ;;  %v918_v31 = vsel %vm917_vm4, %v858_v32, %v916_v22 }
 0x1fd   : > { %v865_v33 = vadd.f32 %v864_v28, %v863_v25  ;;  %v875_v34 = vadd.f32 %v874_v29, %v873_v26 }
 0x1fe   : > { %v870_v35 = vadd.f32 %v869_v30, %v868_v27 }
 0x1ff   : > { %v876_v36 = vrot.slane %v875_v34, 2  ;;  %v920_v37 = vsel %vm919_vm5, %v865_v33, %v918_v31 }
 0x200   : > { %v871_v38 = vrot.slane %v870_v35, 1 }
 0x201   : > { %v877_v39 = vadd.f32 %v876_v36, %v875_v34 }
 0x202   : > { %v872_v40 = vadd.f32 %v871_v38, %v870_v35 }
 0x203   : > { %v878_v41 = vrot.slane %v877_v39, 1 }
 0x204   : > { %v922_v42 = vsel %vm921_vm6, %v872_v40, %v920_v37 }
 0x205   : > { %v879_v43 = vadd.f32 %v878_v41, %v877_v39 }
 0x207   : > { %v924_v44 = vsel %vm923_vm7, %v879_v43, %v922_v42 }
 0x208   : > { %1304 = vmatmul.mubr.f32.vlgmr.msra.gmra.mrb[16].mxu0 %v924_v44 }
 0x2db   : > { %v992_v46 = vpop.f32.mrb[16].mxu0 }
 0x2dc   : > { %v993_v47 = vadd.f32 %v1075_v45, %v992_v46  ;;  %v1305_v48 = vpop.f32.mrb[17].mxu0 }
 0x2de   : > { %v996_v49 = vmax.f32 %v993_v47, 0.0 }
 0x2e0   : > { %997 = vst [vmem:[%s327_s22] sm:$0xff] %v996_v49 }
 0x2e1 PF: > { %s18_s27 = sadd.s32 1, %s1414_s27  }
 0x2e2   : > { %p15_p5 = scmp.ge.s32.totalorder %s18_s27, 4  }
 0x2e4   :  { %17 = sbr.rel (!%p15_p5) target bundleno = 1 (0x1), region = 85 }

</bundles_post_ra>
